<compile_context>
chip_gen: v7x
topology: tpu7x:2x2x1
jax: 0.10.0
libtpu: 0.0.40
codegen_flags: <defaults>
</compile_context>

<pallas_src>
import jax
import jax.numpy as jnp
from jax.experimental import pallas as pl
from jax.experimental.pallas import tpu as pltpu


def tinynet_kernel(x_ref, w1_ref, b1_ref, w2_ref, b2_ref, w3_ref, b3_ref, o_ref):
    # x_ref: (1, TB)  batch on lanes
    x = x_ref[...]                                                   # (1, TB) f32

    # Layer 1: Linear(1, 64). K=1 "matmul" -> VPU broadcast outer product.
    #   (64, 1) * (1, TB) + (64, 1) -> (64, TB)
    h1 = jnp.tanh(w1_ref[...] * x + b1_ref[...])                     # (64, TB) f32

    # Layer 2: Linear(64, 64) on the MXU, batch (TB) on the wide N dimension.
    #   W2 stored (out, in) == already transposed for column-major activations.
    #   Casting h1 to w2_ref.dtype makes this a bf16 x bf16 -> f32 matmul when
    #   the wrapper passes bf16 weights (use_bf16=True); a no-op in f32 mode.
    h2 = jnp.tanh(
        jnp.dot(w2_ref[...], h1.astype(w2_ref.dtype),
                preferred_element_type=jnp.float32)
        + b2_ref[...]
    )                                                                # (64, TB) f32

    # Layer 3: Linear(64, 1) as (1, 64) @ (64, TB) -> lane-dense (1, TB) row.
    out = (
        jnp.dot(w3_ref[...], h2.astype(w3_ref.dtype),
                preferred_element_type=jnp.float32)
        + b3_ref[...]
    )                                                                # (1, TB) f32

    o_ref[...] = out.astype(o_ref.dtype)


def tinynet_forward(x, params, *, tile_b=8192, use_bf16=True):
    """x: (N, 1) float32.  params: w1 (64,1), b1 (64,1), w2 (64,64) [out,in],
    b2 (64,1), w3 (1,64), b3 (1,1).  Returns (N, 1) float32."""
    N = x.shape[0]

    # Lane-dense batch tile: multiple of 128, clamped to [128, 16384].
    # 16384 keeps the two (64, TB) f32 intermediates (+ bf16 MXU copies) under
    # ~12 MiB of VMEM temporaries -> safe for v7x's scoped-VMEM default.
    tile_b = max(128, min(16384, (int(tile_b) // 128) * 128))

    # v7x has 2 TensorCores; a 1-step grid cannot shard the "parallel" axis,
    # so prefer >= 2 grid steps whenever the batch is big enough.
    if N > 128 and pl.cdiv(N, tile_b) < 2:
        tile_b = max(128, ((pl.cdiv(N, 2) + 127) // 128) * 128)

    n_pad = pl.cdiv(N, tile_b) * tile_b

    # Batch onto the lane axis; zero-pad to a multiple of the tile.  Padded
    # lanes produce garbage through tanh(b1) etc. but are sliced off below.
    x_row = x.reshape(1, N).astype(jnp.float32)
    if n_pad != N:
        x_row = jnp.pad(x_row, ((0, 0), (0, n_pad - N)))

    w1, b1 = params["w1"], params["b1"]   # (64, 1), (64, 1)  f32
    w2, b2 = params["w2"], params["b2"]   # (64, 64) [out,in], (64, 1)
    w3, b3 = params["w3"], params["b3"]   # (1, 64), (1, 1)

    # bf16 MXU operands with f32 accumulation: cast the resident weights once
    # in the wrapper (DMA'd once), activations are cast in-kernel at the dot.
    mxu_dtype = jnp.bfloat16 if use_bf16 else jnp.float32
    w2 = w2.astype(mxu_dtype)
    w3 = w3.astype(mxu_dtype)

    grid = (n_pad // tile_b,)

    def resident(shape):
        # Whole array, same block every step -> DMA'd once, stays in VMEM.
        return pl.BlockSpec(shape, lambda i: (0, 0))

    weight_bytes = sum(int(a.size) * a.dtype.itemsize
                       for a in (w1, b1, w2, b2, w3, b3))
    cost = pl.CostEstimate(
        flops=2 * (1 * 64 + 64 * 64 + 64 * 1) * n_pad,   # three linear layers
        transcendentals=128 * n_pad,                     # two tanh over 64 feats
        bytes_accessed=8 * n_pad + weight_bytes,         # x row + out row + weights
    )

    out_row = pl.pallas_call(
        tinynet_kernel,
        out_shape=jax.ShapeDtypeStruct((1, n_pad), jnp.float32),
        grid_spec=pltpu.PrefetchScalarGridSpec(
            num_scalar_prefetch=0,
            grid=grid,
            in_specs=[
                pl.BlockSpec((1, tile_b), lambda i: (0, i)),   # x row tile
                resident(w1.shape), resident(b1.shape),
                resident(w2.shape), resident(b2.shape),
                resident(w3.shape), resident(b3.shape),
            ],
            out_specs=pl.BlockSpec((1, tile_b), lambda i: (0, i)),
        ),
        compiler_params=pltpu.CompilerParams(
            dimension_semantics=("parallel",),
        ),
        cost_estimate=cost,
    )(x_row, w1, b1, w2, b2, w3, b3)

    return out_row[:, :N].reshape(N, 1)


def init_params(key):
    """PyTorch nn.Linear default init (U[-1/sqrt(fan_in), +1/sqrt(fan_in)]).
    Weights kept in PyTorch's (out_features, in_features) layout; biases as
    (out_features, 1) columns to match the batch-on-lanes kernel layout."""
    ks = jax.random.split(key, 6)

    def linear(kw, kb, fan_in, fan_out):
        bound = 1.0 / jnp.sqrt(jnp.float32(fan_in))
        w = jax.random.uniform(kw, (fan_out, fan_in), jnp.float32, -bound, bound)
        b = jax.random.uniform(kb, (fan_out, 1), jnp.float32, -bound, bound)
        return w, b

    w1, b1 = linear(ks[0], ks[1], 1, 64)
    w2, b2 = linear(ks[2], ks[3], 64, 64)
    w3, b3 = linear(ks[4], ks[5], 64, 1)
    return {"w1": w1, "b1": b1, "w2": w2, "b2": b2, "w3": w3, "b3": b3}


def tinynet_ref(x, p):
    # Standard row-major reference (x @ W^T + b), identical to the PyTorch module.
    h1 = jnp.tanh(x @ p["w1"].T + p["b1"].T)
    h2 = jnp.tanh(h1 @ p["w2"].T + p["b2"].T)
    return h2 @ p["w3"].T + p["b3"].T


if __name__ == "__main__":
    key = jax.random.PRNGKey(0)
    k_params, k_x = jax.random.split(key)

    params = init_params(k_params)
    N = 16                                            # small test batch
    x = jax.random.normal(k_x, (N, 1), jnp.float32)   # matches Linear(1, ...) input

    ref = tinynet_ref(x, params)

    # Strict-precision path (f32 MXU passes) -- tight tolerance.
    out_f32 = jax.block_until_ready(
        tinynet_forward(x, params, tile_b=128, use_bf16=False))
    assert out_f32.shape == (N, 1)
    assert jnp.allclose(out_f32, ref, atol=1e-5, rtol=1e-5), \
        "f32 path mismatch vs pure-JAX reference"

    # Production path: bf16 MXU operands + f32 accumulation (~1e-3 error,
    # ~2-3x fewer MXU passes).  Production usage: tile_b=4096-16384.
    out_bf16 = jax.block_until_ready(
        tinynet_forward(x, params, tile_b=128, use_bf16=True))
    assert out_bf16.shape == (N, 1)
    assert jnp.allclose(out_bf16, ref, atol=5e-2, rtol=5e-2), \
        "bf16 path mismatch vs pure-JAX reference"

    print("KERNEL_OK")
</pallas_src>

<mosaic_0001>
module attributes {stable_mosaic.version = 11 : i64} {
  func.func @tinynet_kernel(%arg0: i32, %arg1: memref<1x128xf32, #tpu.memory_space<vmem>>, %arg2: memref<64x1xf32, #tpu.memory_space<vmem>>, %arg3: memref<64x1xf32, #tpu.memory_space<vmem>>, %arg4: memref<64x64xf32, #tpu.memory_space<vmem>>, %arg5: memref<64x1xf32, #tpu.memory_space<vmem>>, %arg6: memref<1x64xf32, #tpu.memory_space<vmem>>, %arg7: memref<1x1xf32, #tpu.memory_space<vmem>>, %arg8: memref<1x128xf32, #tpu.memory_space<vmem>>) attributes {dimension_semantics = [#tpu.dimension_semantics<parallel>], iteration_bounds = array<i64: 1>, scalar_prefetch = 0 : i64, scratch_operands = 0 : i64, tpu.core_type = #tpu.core_type<tc>, window_params = [{transform_indices = @transform_0, window_bounds = array<i64: 1, 128>}, {pipeline_mode = #tpu.pipeline_mode<synchronous>, transform_indices = @transform_1, window_bounds = array<i64: 64, 1>}, {pipeline_mode = #tpu.pipeline_mode<synchronous>, transform_indices = @transform_2, window_bounds = array<i64: 64, 1>}, {pipeline_mode = #tpu.pipeline_mode<synchronous>, transform_indices = @transform_3, window_bounds = array<i64: 64, 64>}, {pipeline_mode = #tpu.pipeline_mode<synchronous>, transform_indices = @transform_4, window_bounds = array<i64: 64, 1>}, {pipeline_mode = #tpu.pipeline_mode<synchronous>, transform_indices = @transform_5, window_bounds = array<i64: 1, 64>}, {pipeline_mode = #tpu.pipeline_mode<synchronous>, transform_indices = @transform_6, window_bounds = array<i64: 1, 1>}, {transform_indices = @transform_7, window_bounds = array<i64: 1, 128>}]} {
    %c0 = arith.constant 0 : index
    %c0_0 = arith.constant 0 : index
    %0 = vector.load %arg1[%c0, %c0_0] : memref<1x128xf32, #tpu.memory_space<vmem>>, vector<1x128xf32>
    %c0_1 = arith.constant 0 : index
    %c0_2 = arith.constant 0 : index
    %1 = vector.load %arg2[%c0_1, %c0_2] : memref<64x1xf32, #tpu.memory_space<vmem>>, vector<64x1xf32>
    %2 = vector.broadcast %1 : vector<64x1xf32> to vector<64x128xf32>
    %3 = vector.broadcast %0 : vector<1x128xf32> to vector<64x128xf32>
    %4 = arith.mulf %2, %3 : vector<64x128xf32>
    %c0_3 = arith.constant 0 : index
    %c0_4 = arith.constant 0 : index
    %5 = vector.load %arg3[%c0_3, %c0_4] : memref<64x1xf32, #tpu.memory_space<vmem>>, vector<64x1xf32>
    %6 = vector.broadcast %5 : vector<64x1xf32> to vector<64x128xf32>
    %7 = arith.addf %4, %6 : vector<64x128xf32>
    %8 = math.tanh %7 : vector<64x128xf32>
    %c0_5 = arith.constant 0 : index
    %c0_6 = arith.constant 0 : index
    %9 = vector.load %arg4[%c0_5, %c0_6] : memref<64x64xf32, #tpu.memory_space<vmem>>, vector<64x64xf32>
    %cst = arith.constant dense<0.000000e+00> : vector<64x128xf32>
    %10 = tpu.matmul %9, %8, %cst {dimension_numbers = #tpu.dot_dimension_numbers<[1], [0], [0], [1], [0, 0, 1, 1], [], []>} : vector<64x64xf32>, vector<64x128xf32>, vector<64x128xf32> -> vector<64x128xf32>
    %c0_7 = arith.constant 0 : index
    %c0_8 = arith.constant 0 : index
    %11 = vector.load %arg5[%c0_7, %c0_8] : memref<64x1xf32, #tpu.memory_space<vmem>>, vector<64x1xf32>
    %12 = vector.broadcast %11 : vector<64x1xf32> to vector<64x128xf32>
    %13 = arith.addf %10, %12 : vector<64x128xf32>
    %14 = math.tanh %13 : vector<64x128xf32>
    %c0_9 = arith.constant 0 : index
    %c0_10 = arith.constant 0 : index
    %15 = vector.load %arg6[%c0_9, %c0_10] : memref<1x64xf32, #tpu.memory_space<vmem>>, vector<1x64xf32>
    %cst_11 = arith.constant dense<0.000000e+00> : vector<1x128xf32>
    %16 = tpu.matmul %15, %14, %cst_11 {dimension_numbers = #tpu.dot_dimension_numbers<[1], [0], [0], [1], [0, 0, 1, 1], [], []>} : vector<1x64xf32>, vector<64x128xf32>, vector<1x128xf32> -> vector<1x128xf32>
    %c0_12 = arith.constant 0 : index
    %c0_13 = arith.constant 0 : index
    %17 = vector.load %arg7[%c0_12, %c0_13] : memref<1x1xf32, #tpu.memory_space<vmem>>, vector<1x1xf32>
    %18 = vector.broadcast %17 : vector<1x1xf32> to vector<1x128xf32>
    %19 = arith.addf %16, %18 : vector<1x128xf32>
    %c0_14 = arith.constant 0 : index
    %c0_15 = arith.constant 0 : index
    %20 = vector.load %arg8[%c0_14, %c0_15] : memref<1x128xf32, #tpu.memory_space<vmem>>, vector<1x128xf32>
    tpu.vector_store %arg8[%c0_14, %c0_15], %19 {strides = array<i32>} : memref<1x128xf32, #tpu.memory_space<vmem>>, vector<1x128xf32>,
    return
  }
  func.func @transform_0(%arg0: i32) -> (i32, i32) {
    %c0_i32 = arith.constant 0 : i32
    %c0_i32_0 = arith.constant 0 : i32
    return %c0_i32, %arg0 : i32, i32
  }
  func.func @transform_1(%arg0: i32) -> (i32, i32) {
    %c0_i32 = arith.constant 0 : i32
    %c0_i32_0 = arith.constant 0 : i32
    %c0_i32_1 = arith.constant 0 : i32
    return %c0_i32, %c0_i32_0 : i32, i32
  }
  func.func @transform_2(%arg0: i32) -> (i32, i32) {
    %c0_i32 = arith.constant 0 : i32
    %c0_i32_0 = arith.constant 0 : i32
    %c0_i32_1 = arith.constant 0 : i32
    return %c0_i32, %c0_i32_0 : i32, i32
  }
  func.func @transform_3(%arg0: i32) -> (i32, i32) {
    %c0_i32 = arith.constant 0 : i32
    %c0_i32_0 = arith.constant 0 : i32
    %c0_i32_1 = arith.constant 0 : i32
    return %c0_i32, %c0_i32_0 : i32, i32
  }
  func.func @transform_4(%arg0: i32) -> (i32, i32) {
    %c0_i32 = arith.constant 0 : i32
    %c0_i32_0 = arith.constant 0 : i32
    %c0_i32_1 = arith.constant 0 : i32
    return %c0_i32, %c0_i32_0 : i32, i32
  }
  func.func @transform_5(%arg0: i32) -> (i32, i32) {
    %c0_i32 = arith.constant 0 : i32
    %c0_i32_0 = arith.constant 0 : i32
    %c0_i32_1 = arith.constant 0 : i32
    return %c0_i32, %c0_i32_0 : i32, i32
  }
  func.func @transform_6(%arg0: i32) -> (i32, i32) {
    %c0_i32 = arith.constant 0 : i32
    %c0_i32_0 = arith.constant 0 : i32
    %c0_i32_1 = arith.constant 0 : i32
    return %c0_i32, %c0_i32_0 : i32, i32
  }
  func.func @transform_7(%arg0: i32) -> (i32, i32) {
    %c0_i32 = arith.constant 0 : i32
    %c0_i32_0 = arith.constant 0 : i32
    return %c0_i32, %arg0 : i32, i32
  }
}

</mosaic_0001>

<bundles_post_ra>
// kernel: tpu_custom_call.1
= control target key start
LH: loop header
LB: loop body
LE: loop exit
PB: predicated region body
PF: predicated region fallthrough
CT: control target
= control target key end

     0   :  { %s793_s0 = inlined_call_operand.vmem [shape: f32[1,128], index: 0, kind: input, shape index: {}]   ;;  %s794_s1 = inlined_call_operand.vmem [shape: f32[64,1], index: 1, kind: input, shape index: {}]   ;;  %s795_s2 = inlined_call_operand.vmem [shape: f32[64,1], index: 2, kind: input, shape index: {}]   ;;  %s796_s3 = inlined_call_operand.vmem [shape: f32[64,64], index: 3, kind: input, shape index: {}]   ;;  %s797_s4 = inlined_call_operand.vmem [shape: f32[64,1], index: 4, kind: input, shape index: {}]   ;;  %s798_s5 = inlined_call_operand.vmem [shape: f32[1,64], index: 5, kind: input, shape index: {}]   ;;  %s799_s6 = inlined_call_operand.<no memory space> [shape: f32[1,1], index: 6, kind: input, shape index: {}]   ;;  %s800_s7 = inlined_call_operand.hbm [shape: f32[1,128], index: 7, kind: output, shape index: {}]  }
   0x1   :  { %v12_v0 = vstv %s799_s6 }
   0x2   :  { %13 = vst [vmem:[#allocation2] sm:$0x1] %v12_v0 }
   0x3   :  { %v92_v1 = vld [vmem:[%s795_s2] sm:$0xff]  ;;  %v622_v3 = vmov 0   ;;  %v93_v4 = vld [vmem:[%s795_s2 + $0x8] sm:$0xff]  ;;  %v33_v6 = vld [vmem:[%s794_s1 + $0x18] sm:$0xff] }
   0x4   :  { %v30_v2 = vld [vmem:[%s794_s1] sm:$0xff]  ;;  %565 = vset.pattern.permute.xlu1 %v622_v3  ;;  %564 = vset.pattern.permute.xlu0 %v622_v3  ;;  %v31_v5 = vld [vmem:[%s794_s1 + $0x8] sm:$0xff]  ;;  %v32_v7 = vld [vmem:[%s794_s1 + $0x10] sm:$0xff] }
   0x5   :  { %102 = vperm.xlu1 %565, %v92_v1   ;;  %40 = vperm.xlu0 %564, %v30_v2  }
   0x9   :  { %107 = vperm.xlu1 %565, %v93_v4   ;;  %45 = vperm.xlu0 %564, %v31_v5  }
   0xa   :  { %14 = vsyncpa [#allocation4], 0  ;;  %v95_v8 = vld [vmem:[%s795_s2 + $0x18] sm:$0xff]  ;;  %v94_v9 = vld [vmem:[%s795_s2 + $0x10] sm:$0xff]  ;;  %vm212_vm0 = vcmask 523264   ;;  %vm624_vm1 = vmmov 0  }
   0xb   :  { %v35_v10 = vld [vmem:[%s794_s1 + $0x28] sm:$0xff]  ;;  %v34_v11 = vld [vmem:[%s794_s1 + $0x20] sm:$0xff]  ;;  %v37_v14 = vld [vmem:[%s794_s1 + $0x38] sm:$0xff]  ;;  %s626_s16 = smov [#allocation3]  }
   0xc   :  { %v97_v12 = vld [vmem:[%s795_s2 + $0x28] sm:$0xff]  ;;  %v96_v13 = vld [vmem:[%s795_s2 + $0x20] sm:$0xff]  ;;  %v36_v15 = vld [vmem:[%s794_s1 + $0x30] sm:$0xff] }
   0xd   :  { %55 = vperm.xlu1 %565, %v33_v6   ;;  %50 = vperm.xlu0 %564, %v32_v7   ;;  %v99_v16 = vld [vmem:[%s795_s2 + $0x38] sm:$0xff]  ;;  %v98_v17 = vld [vmem:[%s795_s2 + $0x30] sm:$0xff]  ;;  %v165_v18 = vld [vmem:[%s797_s4 + $0x8] sm:$0xff]  ;;  %s441_s2 = sshll.u32 %s626_s16, 4  ;;  %s442_s2 = int_to_ptr.vmem [resolvable:$true] %s441_s2 }
   0xe   :  { %v164_v19 = vld [vmem:[%s797_s4] sm:$0xff]  ;;  %v167_v20 = vld [vmem:[%s797_s4 + $0x18] sm:$0xff]  ;;  %v166_v21 = vld [vmem:[%s797_s4 + $0x10] sm:$0xff]  ;;  %s598_s17 = scalar_lea.vmem %s442_s2, 16  ;;  %s602_s18 = scalar_lea.vmem %s442_s2, 32 }
   0xf   :  { %v169_v22 = vld [vmem:[%s797_s4 + $0x28] sm:$0xff]  ;;  %v168_v23 = vld [vmem:[%s797_s4 + $0x20] sm:$0xff]  ;;  %v171_v24 = vld [vmem:[%s797_s4 + $0x38] sm:$0xff]  ;;  %p599_p0 = scmp.ne.s32.totalorder %s442_s2, %s598_s17  ;;  %p603_p1 = scmp.lt.s32.totalorder %s442_s2, %s442_s2 }
  0x10   :  { %v170_v25 = vld [vmem:[%s797_s4 + $0x30] sm:$0xff]  ;;  %v351_v26 = vld [vmem:[#allocation2] sm:$0x1]  ;;  %p604_p2 = scmp.lt.s32.totalorder %s602_s18, %s598_s17 }
  0x11   :  { %117 = vperm.xlu1 %565, %v95_v8   ;;  %112 = vperm.xlu0 %564, %v94_v9   ;;  %v156_v27 = vld [vmem:[%s796_s3] sm:$0xff]  ;;  %v157_v9 = vld [vmem:[%s796_s3 + $0x8] sm:$0xff] }
  0x12   :  { %500 = vmatprep.mubr.msk.f32.mxu0 %vm212_vm0, %v156_v27  ;;  %v449_v28 = vld [vmem:[%s793_s0] ss:$0 sm:$0xff]  ;;  %p605_p3 = por %p604_p2, %p603_p1 }
  0x14   :  { %p606_p4 = pnand %p605_p3, %p599_p0 }
  0x15   :  { %65 = vperm.xlu1 %565, %v35_v10   ;;  %60 = vperm.xlu0 %564, %v34_v11   ;;  %v158_v10 = vld [vmem:[%s796_s3 + $0x10] sm:$0xff]  ;;  %v159_v11 = vld [vmem:[%s796_s3 + $0x18] sm:$0xff] }
  0x19   :  { %127 = vperm.xlu1 %565, %v97_v12   ;;  %122 = vperm.xlu0 %564, %v96_v13   ;;  %v160_v12 = vld [vmem:[%s796_s3 + $0x20] sm:$0xff]  ;;  %v161_v13 = vld [vmem:[%s796_s3 + $0x28] sm:$0xff] }
  0x1d   :  { %75 = vperm.xlu1 %565, %v37_v14   ;;  %70 = vperm.xlu0 %564, %v36_v15   ;;  %v162_v14 = vld [vmem:[%s796_s3 + $0x30] sm:$0xff]  ;;  %v163_v15 = vld [vmem:[%s796_s3 + $0x38] sm:$0xff] }
  0x21   :  { %137 = vperm.xlu1 %565, %v99_v16   ;;  %132 = vperm.xlu0 %564, %v98_v17   ;;  %v623_v16 = vmov 0.0|0.0   ;;  %v625_v17 = vmov 0.0  }
  0x22   :  { %547 = vmatprep.subr.bf16.mxu1 %v623_v16  ;;  %528 = vmatprep.mubr.msk.f32.mxu1 %vm624_vm1, %v625_v17 }
  0x25   :  { %179 = vperm.xlu1 %565, %v165_v18   ;;  %174 = vperm.xlu0 %564, %v164_v19  }
  0x29   :  { %189 = vperm.xlu1 %565, %v167_v20   ;;  %184 = vperm.xlu0 %564, %v166_v21  }
  0x2d   :  { %199 = vperm.xlu1 %565, %v169_v22   ;;  %194 = vperm.xlu0 %564, %v168_v23  }
  0x31   :  { %209 = vperm.xlu1 %565, %v171_v24   ;;  %204 = vperm.xlu0 %564, %v170_v25  }
  0x35   :  { %354 = vperm.xlu0 %564, %v351_v26  }
  0x84   :  { %v103_v29 = vpop.permute.xlu1 %102  ;;  %v41_v30 = vpop.permute.xlu0 %40 }
  0x85   :  { %v84_v31 = vmul.f32 %v449_v28, %v41_v30 }
  0x87   :  { %v140_v32 = vadd.f32 %v103_v29, %v84_v31 }
  0x88   :  { %v108_v33 = vpop.permute.xlu1 %107  ;;  %v46_v34 = vpop.permute.xlu0 %45 }
  0x89   :  { %v85_v35 = vmul.f32 %v449_v28, %v46_v34  ;;  %566 = vtanh.f32 %v140_v32 }
  0x8b   :  { %v141_v36 = vadd.f32 %v108_v33, %v85_v35 }
  0x8c   :  { %v56_v37 = vpop.permute.xlu1 %55  ;;  %v51_v38 = vpop.permute.xlu0 %50 }
  0x8d   :  { %568 = vtanh.f32 %v141_v36  ;;  %v87_v39 = vmul.f32 %v449_v28, %v56_v37  ;;  %v86_v40 = vmul.f32 %v449_v28, %v51_v38 }
  0x90   :  { %v118_v41 = vpop.permute.xlu1 %117  ;;  %v113_v42 = vpop.permute.xlu0 %112 }
  0x91   :  { %v143_v43 = vadd.f32 %v118_v41, %v87_v39  ;;  %v142_v44 = vadd.f32 %v113_v42, %v86_v40 }
  0x93   :  { %570 = vtanh.f32 %v143_v43  ;;  %v567_v47 = vpop.eup %566 }
  0x94   :  { %572 = vtanh.f32 %v142_v44  ;;  %v66_v45 = vpop.permute.xlu1 %65  ;;  %v61_v46 = vpop.permute.xlu0 %60 }
  0x95   :  { %v89_v49 = vmul.f32 %v449_v28, %v66_v45  ;;  %v88_v50 = vmul.f32 %v449_v28, %v61_v46 }
  0x97   :  { %v569_v48 = vpop.eup %568 }
  0x98   :  { %v128_v51 = vpop.permute.xlu1 %127  ;;  %v123_v52 = vpop.permute.xlu0 %122  ;;  %v531_v53 = vpack.c.bf16 %v569_v48, %v567_v47 }
  0x99   :  { %v145_v54 = vadd.f32 %v128_v51, %v89_v49  ;;  %v144_v55 = vadd.f32 %v123_v52, %v88_v50 }
  0x9a   :  { %532 = vmatprep.subr.bf16.mxu0 %v531_v53 }
  0x9b   :  { %574 = vtanh.f32 %v145_v54  ;;  %534 = vmatpush3.bf16.msra.mxu0 %v531_v53  ;;  %v350_v54 = vld [vmem:[%s798_s5] sm:$0x1] }
  0x9c   :  { %576 = vtanh.f32 %v144_v55  ;;  %v76_v56 = vpop.permute.xlu1 %75  ;;  %v71_v57 = vpop.permute.xlu0 %70  ;;  %v357_v55 = vlaneseq }
  0x9d   :  { %v571_v58 = vpop.eup %570  ;;  %v91_v60 = vmul.f32 %v449_v28, %v76_v56  ;;  %v90_v61 = vmul.f32 %v449_v28, %v71_v57 }
  0x9e   :  { %v573_v59 = vpop.eup %572  ;;  %v358_v56 = vshrl.u32 %v357_v55, 7 }
  0x9f   :  { %v535_v62 = vpack.c.bf16 %v571_v58, %v573_v59 }
  0xa0   :  { %v138_v63 = vpop.permute.xlu1 %137  ;;  %v133_v0 = vpop.permute.xlu0 %132  ;;  %v359_v57 = vsub.s32 0, %v358_v56 }
  0xa1   :  { %v147_v1 = vadd.f32 %v138_v63, %v91_v60  ;;  %v146_v2 = vadd.f32 %v133_v0, %v90_v61  ;;  %536 = vmatprep.subr.bf16.mxu0 %v535_v62 }
  0xa2   :  { %538 = vmatpush3.bf16.msra.mxu0 %v535_v62 }
  0xa3   :  { %578 = vtanh.f32 %v147_v1 }
  0xa4   :  { %580 = vtanh.f32 %v146_v2  ;;  %v180_v18 = vpop.permute.xlu1 %179  ;;  %v175_v19 = vpop.permute.xlu0 %174 }
  0xa5   :  { %v575_v3 = vpop.eup %574 }
  0xa6   :  { %v577_v4 = vpop.eup %576 }
  0xa7   :  { %v539_v5 = vpack.c.bf16 %v575_v3, %v577_v4 }
  0xa8   :  { %v190_v20 = vpop.permute.xlu1 %189  ;;  %v185_v22 = vpop.permute.xlu0 %184 }
  0xa9   :  { %540 = vmatprep.subr.bf16.mxu0 %v539_v5 }
  0xaa   :  { %542 = vmatpush3.bf16.msra.mxu0 %v539_v5 }
  0xac   :  { %v200_v29 = vpop.permute.xlu1 %199  ;;  %v195_v31 = vpop.permute.xlu0 %194 }
  0xad   :  { %v579_v6 = vpop.eup %578 }
  0xae   :  { %v581_v7 = vpop.eup %580 }
  0xaf   :  { %v543_v8 = vpack.c.bf16 %v579_v6, %v581_v7 }
  0xb0   :  { %v210_v36 = vpop.permute.xlu1 %209  ;;  %v205_v39 = vpop.permute.xlu0 %204 }
  0xb1   :  { %544 = vmatprep.subr.bf16.mxu0 %v543_v8 }
  0xb2   :  { %546 = vmatpush3.bf16.msra.mxu0 %v543_v8 }
  0xb4   :  { %v355_v58 = vpop.permute.xlu0 %354 }
  0xb5   :  { %501 = vmatmul.mubr.msk.f32.vlgmr.msra.gmra.mrb[0].mxu0 %vm212_vm0, %v157_v9  ;;  %v360_v59 = vrot.slane %v355_v58, %v359_v57 }
  0xb6   :  { %503 = vmatprep.mubr.msk.f32.mxu0 %vm212_vm0, %v158_v10 }
  0xb9   :  { %504 = vmatmul.mubr.msk.f32.gmra.mrb[2].mxu0 %vm212_vm0, %v159_v11 }
  0xba   :  { %506 = vmatprep.mubr.msk.f32.mxu0 %vm212_vm0, %v160_v12 }
  0xbd   :  { %507 = vmatmul.mubr.msk.f32.gmra.mrb[4].mxu0 %vm212_vm0, %v161_v13 }
  0xbe   :  { %509 = vmatprep.mubr.msk.f32.mxu0 %vm212_vm0, %v162_v14 }
  0xc1   :  { %510 = vmatmul.mubr.msk.f32.gmra.mrb[6].mxu0 %vm212_vm0, %v163_v15 }
 0x188   :  { %v502_v21 = vpop.f32.mrb[0].mxu0 }
 0x189   :  { %v309_v23 = vadd.f32 %v502_v21, %v180_v18  ;;  %v303_v24 = vpop.f32.mrb[1].mxu0 }
 0x18a   :  { %v304_v25 = vadd.f32 %v303_v24, %v175_v19 }
 0x18b   :  { %582 = vtanh.f32 %v309_v23 }
 0x18c   :  { %584 = vtanh.f32 %v304_v25  ;;  %v505_v26 = vpop.f32.mrb[2].mxu0 }
 0x18d   :  { %v319_v27 = vadd.f32 %v505_v26, %v190_v20  ;;  %v313_v28 = vpop.f32.mrb[3].mxu0 }
 0x18e   :  { %v314_v30 = vadd.f32 %v313_v28, %v185_v22 }
 0x18f   :  { %586 = vtanh.f32 %v319_v27 }
 0x190   :  { %588 = vtanh.f32 %v314_v30  ;;  %v508_v32 = vpop.f32.mrb[4].mxu0 }
 0x191   :  { %v329_v33 = vadd.f32 %v508_v32, %v200_v29  ;;  %v323_v34 = vpop.f32.mrb[5].mxu0 }
 0x192   :  { %v324_v35 = vadd.f32 %v323_v34, %v195_v31 }
 0x193   :  { %590 = vtanh.f32 %v329_v33 }
 0x194   :  { %592 = vtanh.f32 %v324_v35  ;;  %v511_v37 = vpop.f32.mrb[6].mxu0 }
 0x195   :  { %v583_v38 = vpop.eup %582  ;;  %v339_v40 = vadd.f32 %v511_v37, %v210_v36  ;;  %v333_v41 = vpop.f32.mrb[7].mxu0 }
 0x196   :  { %v585_v42 = vpop.eup %584  ;;  %v334_v43 = vadd.f32 %v333_v41, %v205_v39 }
 0x197   :  { %594 = vtanh.f32 %v339_v40  ;;  %v548_v44 = vpack.c.bf16 %v583_v38, %v585_v42 }
 0x198   :  { %596 = vtanh.f32 %v334_v43 }
 0x199   :  { %v587_v45 = vpop.eup %586  ;;  %549 = vmatpush3.bf16.msra.mxu1 %v548_v44 }
 0x19a   :  { %v589_v46 = vpop.eup %588  ;;  %550 = vmatprep.subr.bf16.mxu1 %v623_v16 }
 0x19b   :  { %v551_v47 = vpack.c.bf16 %v587_v45, %v589_v46 }
 0x19d   :  { %v591_v48 = vpop.eup %590  ;;  %552 = vmatpush3.bf16.msra.mxu1 %v551_v47 }
 0x19e   :  { %v593_v49 = vpop.eup %592  ;;  %553 = vmatprep.subr.bf16.mxu1 %v623_v16 }
 0x19f   :  { %v554_v50 = vpack.c.bf16 %v591_v48, %v593_v49 }
 0x1a1   :  { %v595_v51 = vpop.eup %594  ;;  %555 = vmatpush3.bf16.msra.mxu1 %v554_v50 }
 0x1a2   :  { %v597_v52 = vpop.eup %596  ;;  %556 = vmatprep.subr.bf16.mxu1 %v623_v16 }
 0x1a3   :  { %v557_v53 = vpack.c.bf16 %v595_v51, %v597_v52 }
 0x1a5   :  { %558 = vmatpush3.bf16.msra.mxu1 %v557_v53 }
 0x1a8   :  { %529 = vmatmul.mubr.msk.f32.vlgmr.msra.gmra.mrb[0].mxu1 %vm212_vm0, %v350_v54 }
 0x27b   :  { %v430_v60 = vpop.f32.mrb[0].mxu1 }
 0x27c   :  { %v431_v61 = vadd.f32 %v430_v60, %v360_v59  ;;  %v530_v62 = vpop.f32.mrb[1].mxu1 }
 0x27e   :  { %434 = vst [vmem:[#allocation3] sm:$0x1] %v431_v61 }
 0x27f   :  { %609 = shalt.err (!%p606_p4)
}
 0x280   :  { %s610_s20 = scalar_lea.hbm %s800_s7, 16 }
 0x281   :  { %p611_p5 = scmp.ne.s32.totalorder %s800_s7, %s610_s20  ;;  %p614_p6 = scmp.lt.u32.totalorder %s610_s20, %s800_s7 }
 0x283   :  { %p616_p7 = pnand %p614_p6, %p611_p5 }
 0x285   :  { %619 = shalt.err (!%p616_p7)
}
 0x286   :  { %444 = dma.vmem_to_hbm [thread:$0]  %s442_s2, 16, %s800_s7, [#allocation4]  }
 0x287   :  { %620 = dma.done.wait [#allocation4], 16  }
 0x288   :  { %621 = vsyncadd [#allocation4], 4294967280 }
 0x289   :  { %448 = vsyncpa [#allocation4], 1 }

</bundles_post_ra>
